<compile_context>
chip_gen: v5e
topology: v5e:2x2
jax: 0.10.0
libtpu: 0.0.40
codegen_flags: <defaults>
</compile_context>

<pallas_src>
import jax
import jax.numpy as jnp
from jax import lax
from jax.experimental import pallas as pl
from jax.experimental.pallas import tpu as pltpu


def _reservoir_seq_kernel(x_ref, w_ref, state0_ref,
                          spike_ref, final_state_ref,
                          state_sc):
    """One grid step == one reservoir time step; state carried in VMEM scratch."""
    t = pl.program_id(0)

    @pl.when(t == 0)
    def _init():
        state_sc[...] = state0_ref[...]

    # state @ C for the cyclic permutation C == roll state right by one lane (XLU).
    recur = pltpu.roll(state_sc[...], shift=1, axis=1)

    # x_t @ W_in.T without materializing the transpose (rhs-transposed matmul, MXU).
    pre = lax.dot_general(
        x_ref[...], w_ref[...],
        dimension_numbers=(((1,), (1,)), ((), ())),
        preferred_element_type=jnp.float32,
    )
    new_state = jnp.tanh(pre + recur)                       # EUP transcendental

    state_sc[...] = new_state
    # heaviside(x, 0): 1 where x > 0, else 0 (including exactly 0)
    spike_ref[...] = (new_state > 0.0).astype(spike_ref.dtype)

    @pl.when(t == pl.num_programs(0) - 1)
    def _finalize():
        final_state_ref[...] = new_state.astype(final_state_ref.dtype)


def reservoir_forward(xs, input_weights, init_state=None):
    """Run the cyclic reservoir over a whole sequence in one Pallas kernel.

    xs:            (T, B, I) float32  -- one module-forward per t
    input_weights: (O, I)    float32  -- native PyTorch layout, never transposed
    init_state:    (B, O)    float32  -- reservoir state before step 0 (zeros if None)

    Returns (spikes, final_state):
      spikes:      (T, B, O) float32  -- heaviside(state_t) for every step
      final_state: (B, O)    float32  -- reservoir state after the last step
    """
    T, B, I = xs.shape
    O = input_weights.shape[0]
    if init_state is None:
        init_state = jnp.zeros((B, O), dtype=jnp.float32)

    flops = T * (2 * B * I * O + 2 * B * O)
    bytes_accessed = 4 * (T * B * I + O * I + B * O + T * B * O + B * O)

    spikes, final_state = pl.pallas_call(
        _reservoir_seq_kernel,
        out_shape=(
            jax.ShapeDtypeStruct((T, B, O), jnp.float32),   # spikes, all steps
            jax.ShapeDtypeStruct((B, O), jnp.float32),      # final state
        ),
        grid=(T,),
        in_specs=[
            pl.BlockSpec((None, B, I), lambda t: (t, 0, 0)),  # x_t (per step)
            pl.BlockSpec((O, I), lambda t: (0, 0)),           # W_in (VMEM-resident)
            pl.BlockSpec((B, O), lambda t: (0, 0)),           # initial state
        ],
        out_specs=(
            pl.BlockSpec((None, B, O), lambda t: (t, 0, 0)),  # spikes[t]
            pl.BlockSpec((B, O), lambda t: (0, 0)),           # final state (resident)
        ),
        scratch_shapes=[pltpu.VMEM((B, O), jnp.float32)],     # recurrent state
        compiler_params=pltpu.CompilerParams(
            dimension_semantics=("arbitrary",)),              # sequential recurrence
        cost_estimate=pl.CostEstimate(
            flops=flops,
            transcendentals=T * B * O,
            bytes_accessed=bytes_accessed),
    )(xs, input_weights, init_state)
    return spikes, final_state


def make_params(key, input_size, output_size):
    """Deterministic parameter init matching the PyTorch __init__."""
    input_weights = jax.random.uniform(
        key, (output_size, input_size), dtype=jnp.float32)      # torch.rand
    cycle = jnp.zeros((output_size, output_size), dtype=jnp.float32)
    cycle = cycle + jnp.diag(jnp.ones(output_size - 1, jnp.float32), k=1)
    cycle = cycle + jnp.diag(jnp.ones(1, jnp.float32), k=-(output_size - 1))
    return input_weights, cycle


if __name__ == "__main__":
    key = jax.random.PRNGKey(0)
    k_w, k_x = jax.random.split(key)

    seq_len = 8
    batch = 8
    input_size = 32
    output_size = 128

    input_weights, cycle_connections = make_params(k_w, input_size, output_size)
    xs = jax.random.normal(k_x, (seq_len, batch, input_size), dtype=jnp.float32)

    # First pass: state implicitly reset to zeros (like the module's first forward).
    spikes, final_state = reservoir_forward(xs, input_weights)
    # Second pass chained from the stored state (exercises nonzero init state).
    spikes2, final_state2 = reservoir_forward(xs, input_weights, final_state)
    jax.block_until_ready((spikes, final_state, spikes2, final_state2))

    # Plain-JAX reference using the module's dense cyclic matrix.
    def ref_run(xs, state):
        out = []
        for t in range(xs.shape[0]):
            state = jnp.tanh(xs[t] @ input_weights.T + state @ cycle_connections)
            out.append(jnp.where(state > 0.0, 1.0, 0.0))
        return jnp.stack(out), state

    ref_spikes, ref_state = ref_run(xs, jnp.zeros((batch, output_size), jnp.float32))
    ref_spikes2, ref_state2 = ref_run(xs, ref_state)

    assert jnp.allclose(final_state, ref_state, atol=1e-5)
    assert jnp.allclose(spikes, ref_spikes)
    assert jnp.allclose(final_state2, ref_state2, atol=1e-5)
    assert jnp.allclose(spikes2, ref_spikes2)

    print("KERNEL_OK")
</pallas_src>

<mosaic_0001>
module attributes {stable_mosaic.version = 11 : i64} {
  func.func @_reservoir_seq_kernel(%arg0: i32, %arg1: memref<1x8x32xf32, #tpu.memory_space<vmem>>, %arg2: memref<128x32xf32, #tpu.memory_space<vmem>>, %arg3: memref<8x128xf32, #tpu.memory_space<vmem>>, %arg4: memref<1x8x128xf32, #tpu.memory_space<vmem>>, %arg5: memref<8x128xf32, #tpu.memory_space<vmem>>, %arg6: memref<8x128xf32, #tpu.memory_space<vmem>>) attributes {dimension_semantics = [#tpu.dimension_semantics<arbitrary>], iteration_bounds = array<i64: 8>, scalar_prefetch = 0 : i64, scratch_operands = 1 : i64, tpu.core_type = #tpu.core_type<tc>, window_params = [{transform_indices = @transform_0, window_bounds = array<i64: 1, 8, 32>}, {pipeline_mode = #tpu.pipeline_mode<synchronous>, transform_indices = @transform_1, window_bounds = array<i64: 128, 32>}, {pipeline_mode = #tpu.pipeline_mode<synchronous>, transform_indices = @transform_2, window_bounds = array<i64: 8, 128>}, {transform_indices = @transform_3, window_bounds = array<i64: 1, 8, 128>}, {pipeline_mode = #tpu.pipeline_mode<synchronous>, transform_indices = @transform_4, window_bounds = array<i64: 8, 128>}]} {
    %c0_i32 = arith.constant 0 : i32
    %0 = arith.cmpi eq, %arg0, %c0_i32 : i32
    %1 = arith.extui %0 : i1 to i32
    %c0_i32_0 = arith.constant 0 : i32
    %2 = arith.cmpi ne, %1, %c0_i32_0 : i32
    scf.if %2 {
      %c0_14 = arith.constant 0 : index
      %c0_15 = arith.constant 0 : index
      %22 = vector.load %arg3[%c0_14, %c0_15] : memref<8x128xf32, #tpu.memory_space<vmem>>, vector<8x128xf32>
      %c0_16 = arith.constant 0 : index
      %c0_17 = arith.constant 0 : index
      %23 = vector.load %arg6[%c0_16, %c0_17] : memref<8x128xf32, #tpu.memory_space<vmem>>, vector<8x128xf32>
      tpu.vector_store %arg6[%c0_16, %c0_17], %22 {strides = array<i32>} : memref<8x128xf32, #tpu.memory_space<vmem>>, vector<8x128xf32>,
    } else {
    }
    %c0 = arith.constant 0 : index
    %c0_1 = arith.constant 0 : index
    %3 = vector.load %arg6[%c0, %c0_1] : memref<8x128xf32, #tpu.memory_space<vmem>>, vector<8x128xf32>
    %c1_i32 = arith.constant 1 : i32
    %4 = tpu.dynamic_rotate %3 by %c1_i32 dim 1 : vector<8x128xf32>, i32 -> vector<8x128xf32>
    %c0_2 = arith.constant 0 : index
    %c0_3 = arith.constant 0 : index
    %c0_4 = arith.constant 0 : index
    %5 = vector.load %arg1[%c0_2, %c0_3, %c0_4] : memref<1x8x32xf32, #tpu.memory_space<vmem>>, vector<1x8x32xf32>
    %6 = vector.shape_cast %5 : vector<1x8x32xf32> to vector<8x32xf32>
    %c0_5 = arith.constant 0 : index
    %c0_6 = arith.constant 0 : index
    %7 = vector.load %arg2[%c0_5, %c0_6] : memref<128x32xf32, #tpu.memory_space<vmem>>, vector<128x32xf32>
    %cst = arith.constant dense<0.000000e+00> : vector<8x128xf32>
    %8 = tpu.matmul %6, %7, %cst {dimension_numbers = #tpu.dot_dimension_numbers<[1], [1], [0], [0], [0, 0, 1, 0], [], []>} : vector<8x32xf32>, vector<128x32xf32>, vector<8x128xf32> -> vector<8x128xf32>
    %9 = arith.addf %8, %4 : vector<8x128xf32>
    %10 = math.tanh %9 : vector<8x128xf32>
    %c0_7 = arith.constant 0 : index
    %c0_8 = arith.constant 0 : index
    %11 = vector.load %arg6[%c0_7, %c0_8] : memref<8x128xf32, #tpu.memory_space<vmem>>, vector<8x128xf32>
    tpu.vector_store %arg6[%c0_7, %c0_8], %10 {strides = array<i32>} : memref<8x128xf32, #tpu.memory_space<vmem>>, vector<8x128xf32>,
    %cst_9 = arith.constant 0.000000e+00 : f32
    %12 = vector.broadcast %cst_9 : f32 to vector<8x128xf32>
    %13 = arith.cmpf ogt, %10, %12 : vector<8x128xf32>
    %14 = arith.extui %13 : vector<8x128xi1> to vector<8x128xi32>
    %15 = arith.sitofp %14 : vector<8x128xi32> to vector<8x128xf32>
    %c0_10 = arith.constant 0 : index
    %c0_11 = arith.constant 0 : index
    %c0_12 = arith.constant 0 : index
    %16 = vector.load %arg4[%c0_10, %c0_11, %c0_12] : memref<1x8x128xf32, #tpu.memory_space<vmem>>, vector<1x8x128xf32>
    %17 = vector.shape_cast %16 : vector<1x8x128xf32> to vector<8x128xf32>
    %18 = vector.shape_cast %15 : vector<8x128xf32> to vector<1x8x128xf32>
    tpu.vector_store %arg4[%c0_10, %c0_11, %c0_12], %18 {strides = array<i32>} : memref<1x8x128xf32, #tpu.memory_space<vmem>>, vector<1x8x128xf32>,
    %c7_i32 = arith.constant 7 : i32
    %19 = arith.cmpi eq, %arg0, %c7_i32 : i32
    %20 = arith.extui %19 : i1 to i32
    %c0_i32_13 = arith.constant 0 : i32
    %21 = arith.cmpi ne, %20, %c0_i32_13 : i32
    scf.if %21 {
      %c0_14 = arith.constant 0 : index
      %c0_15 = arith.constant 0 : index
      %22 = vector.load %arg5[%c0_14, %c0_15] : memref<8x128xf32, #tpu.memory_space<vmem>>, vector<8x128xf32>
      tpu.vector_store %arg5[%c0_14, %c0_15], %10 {strides = array<i32>} : memref<8x128xf32, #tpu.memory_space<vmem>>, vector<8x128xf32>,
    } else {
    }
    return
  }
  func.func @transform_0(%arg0: i32) -> (i32, i32, i32) {
    %c0_i32 = arith.constant 0 : i32
    %c0_i32_0 = arith.constant 0 : i32
    %c0_i32_1 = arith.constant 0 : i32
    return %arg0, %c0_i32, %c0_i32_0 : i32, i32, i32
  }
  func.func @transform_1(%arg0: i32) -> (i32, i32) {
    %c0_i32 = arith.constant 0 : i32
    %c0_i32_0 = arith.constant 0 : i32
    %c0_i32_1 = arith.constant 0 : i32
    return %c0_i32, %c0_i32_0 : i32, i32
  }
  func.func @transform_2(%arg0: i32) -> (i32, i32) {
    %c0_i32 = arith.constant 0 : i32
    %c0_i32_0 = arith.constant 0 : i32
    %c0_i32_1 = arith.constant 0 : i32
    return %c0_i32, %c0_i32_0 : i32, i32
  }
  func.func @transform_3(%arg0: i32) -> (i32, i32, i32) {
    %c0_i32 = arith.constant 0 : i32
    %c0_i32_0 = arith.constant 0 : i32
    %c0_i32_1 = arith.constant 0 : i32
    return %arg0, %c0_i32, %c0_i32_0 : i32, i32, i32
  }
  func.func @transform_4(%arg0: i32) -> (i32, i32) {
    %c0_i32 = arith.constant 0 : i32
    %c0_i32_0 = arith.constant 0 : i32
    %c0_i32_1 = arith.constant 0 : i32
    return %c0_i32, %c0_i32_0 : i32, i32
  }
}

</mosaic_0001>

<bundles_post_ra>
// kernel: tpu_custom_call.1
= control target key start
LH: loop header
LB: loop body
LE: loop exit
PB: predicated region body
PF: predicated region fallthrough
CT: control target
= control target key end

     0   :  { %10 = vsyncpa [#allocation4], 0  ;;  %s786_s0 = inlined_call_operand.vmem [shape: f32[8,8,32], index: 0, kind: input, shape index: {}]   ;;  %s787_s1 = inlined_call_operand.vmem [shape: f32[128,32], index: 1, kind: input, shape index: {}]   ;;  %s788_s2 = inlined_call_operand.vmem [shape: f32[8,128], index: 2, kind: input, shape index: {}]   ;;  %s789_s3 = inlined_call_operand.hbm [shape: f32[8,8,128], index: 3, kind: output, shape index: {0}]   ;;  %s790_s4 = inlined_call_operand.hbm [shape: f32[8,128], index: 4, kind: output, shape index: {1}]  }
   0x1   :  { %12 = vsyncpa [#allocation4 + $0x1], 0 }
   0x2   :  { %13 = vsyncpa [#allocation6], 0  ;;  %s606_s15 = smov 0   ;;  %s608_s16 = smov 0  }
   0x3   :  { %s610_s17 = smov 0   ;;  %s612_s18 = smov 0  }
   0x4 LB: > { %s627_s19 = sadd.s32 4294967295, %s576_s18   ;;  %s400_s20 = sadd.s32 4294967294, %s576_s18   ;;  %s576_s18 = sphi %s612_s18, %s796_s18   ;;  %s572_s17 = sphi %s610_s17, %s795_s17   ;;  %s568_s16 = sphi %s608_s16, %s794_s16   ;;  %s564_s15 = sphi %s606_s15, %s793_s15  }
   0x5   : > { %s631_s21 = sadd.s32 1, %s576_s18   ;;  %s94_s22 = sadd.s32 1, %s572_s17 }
   0x6   : > { %s91_s23 = ssub.s32 %s576_s18, %s631_s21  ;;  %p104_p0 = scmp.ne.s32.totalorder %s572_s17, %s568_s16 }
   0x7   : > { %p92_p1 = scmp.eq.s32.totalorder %s91_s23, 0  ;;  %p105_p2 = scmp.eq.s32.totalorder %s627_s19, 7 }
   0x8   : > { %p110_p3 = scmp.ne.s32.totalorder %s568_s16, %s564_s15  ;;  %p111_p4 = scmp.eq.s32.totalorder %s400_s20, 7 }
   0x9   : > { %s642_s24 = scalar_select %p92_p1, %s572_s17, %s94_s22  }
   0xa   : > { %p646_p5 = por %p105_p2, %p104_p0  ;;  %p650_p6 = por %p111_p4, %p110_p3 }
   0xb   : > { %p403_p7 = scmp.ge.s32.totalorder %s576_s18, 1  ;;  %p163_p8 = scmp.lt.s32.totalorder %s576_s18, 9 }
   0xd   : > { %p164_p9 = pnand %p403_p7, %p163_p8 }
   0xe   : > { %s183_s27 = sand.u32 (!%p164_p9), 1, %s568_s16   ;;  %p188_p10 = scmp.lt.s32.totalorder (!%p164_p9), %s627_s19, 7 }
   0xf   : > { %167 = sbr.rel (%p164_p9) target bundleno = 251 (0xfb), region = 32  ;;  %s660_s28 = sshll.u32 (!%p164_p9), %s183_s27, 3 }
  0x10   : > { %s185_s8 = scalar_lea.vmem (!%p164_p9), [#allocation3], %s660_s28  ;;  %p406_p11 = scmp.ne.s32.totalorder (!%p164_p9), %s627_s19, 0 }
  0x14   : > { %s189_s29 = scalar_select %p188_p10, %s627_s19, 7 }
  0x15   : > { %195 = sbr.rel (%p406_p11) target bundleno = 28 (0x1c), region = 36 }
  0x16   : > { %s405_s30 = sshll.u32 %s189_s29, 3 }
  0x17   : > { %s666_s7 = scalar_lea.vmem %s786_s0, %s405_s30 }
  0x1a   : > { %v196_v0 = vld [vmem:[%s788_s2] sm:$0xff] }
  0x1b   : > { %197 = vst [vmem:[#allocation2] sm:$0xff] %v196_v0 }
  0x1c PF: > { %v217_v1 = vld [vmem:[%s787_s1 + $0x78] sm:$0xff]  ;;  %vm218_vm0 = vcmask 261120   ;;  %v216_v2 = vld [vmem:[%s787_s1 + $0x70] sm:$0xff]  ;;  %v215_v3 = vld [vmem:[%s787_s1 + $0x68] sm:$0xff]  ;;  %s578_s22 = smov 1   ;;  %v579_v23 = vmov 0.0  }
  0x1d   : > { %407 = vmatpush.xpose.msk.msra.mxu0 %vm218_vm0, %v217_v1  ;;  %v214_v4 = vld [vmem:[%s787_s1 + $0x60] sm:$0xff]  ;;  %v213_v5 = vld [vmem:[%s787_s1 + $0x58] sm:$0xff]  ;;  %v212_v6 = vld [vmem:[%s787_s1 + $0x50] sm:$0xff]  ;;  %p425_p12 = scmp.ne.s32.totalorder %s627_s19, 7 }
  0x1e   : > { %v211_v7 = vld [vmem:[%s787_s1 + $0x48] sm:$0xff]  ;;  %v210_v8 = vld [vmem:[%s787_s1 + $0x40] sm:$0xff]  ;;  %v209_v9 = vld [vmem:[%s787_s1 + $0x38] sm:$0xff] }
  0x1f   : > { %v208_v11 = vld [vmem:[%s787_s1 + $0x30] sm:$0xff]  ;;  %v207_v12 = vld [vmem:[%s787_s1 + $0x28] sm:$0xff]  ;;  %v206_v13 = vld [vmem:[%s787_s1 + $0x20] sm:$0xff] }
  0x20   : > { %v205_v14 = vld [vmem:[%s787_s1 + $0x18] sm:$0xff]  ;;  %v204_v15 = vld [vmem:[%s787_s1 + $0x10] sm:$0xff]  ;;  %v203_v16 = vld [vmem:[%s787_s1 + $0x8] sm:$0xff] }
  0x21   : > { %408 = vmatpush.xpose.msk.msra.mxu0 %vm218_vm0, %v216_v2  ;;  %v202_v17 = vld [vmem:[%s787_s1] sm:$0xff] }
  0x22   : > { %v198_v10 = vld [vmem:[#allocation2] sm:$0xff] }
  0x23   : > { %199 = vrot.lane.b32.xlu0 %v198_v10, %s578_s22  ;;  %v201_v18 = vld [vmem:[%s666_s7] sm:$0xff] }
  0x25   : > { %409 = vmatpush.xpose.msk.msra.mxu0 %vm218_vm0, %v215_v3 }
  0x29   : > { %410 = vmatpush.xpose.msk.msra.mxu0 %vm218_vm0, %v214_v4 }
  0x2d   : > { %411 = vmatpush.xpose.msk.msra.mxu0 %vm218_vm0, %v213_v5 }
  0x31   : > { %412 = vmatpush.xpose.msk.msra.mxu0 %vm218_vm0, %v212_v6 }
  0x35   : > { %413 = vmatpush.xpose.msk.msra.mxu0 %vm218_vm0, %v211_v7 }
  0x39   : > { %414 = vmatpush.xpose.msk.msra.mxu0 %vm218_vm0, %v210_v8 }
  0x3d   : > { %415 = vmatpush.xpose.msk.msra.mxu0 %vm218_vm0, %v209_v9 }
  0x41   : > { %416 = vmatpush.xpose.msk.msra.mxu0 %vm218_vm0, %v208_v11 }
  0x45   : > { %417 = vmatpush.xpose.msk.msra.mxu0 %vm218_vm0, %v207_v12 }
  0x49   : > { %418 = vmatpush.xpose.msk.msra.mxu0 %vm218_vm0, %v206_v13 }
  0x4d   : > { %419 = vmatpush.xpose.msk.msra.mxu0 %vm218_vm0, %v205_v14 }
  0x51   : > { %420 = vmatpush.xpose.msk.msra.mxu0 %vm218_vm0, %v204_v15 }
  0x55   : > { %421 = vmatpush.xpose.msk.msra.mxu0 %vm218_vm0, %v203_v16 }
  0x59   : > { %422 = vmatpush.xpose.msk.msra.mxu0 %vm218_vm0, %v202_v17 }
  0x5c   : > { %423 = vmatmul.msk.f32.vlgmr.msra.gmra.mxu0 %vm218_vm0, %v201_v18 }
  0x95   : > { %v200_v19 = vpop.permute.xlu0 %199 }
  0xd9   : > { %v287_v20 = vpop.f32.mrf.mxu0 }
  0xda   : > { %v288_v21 = vadd.f32 %v287_v20, %v200_v19 }
  0xdc   : > { %480 = vtanh.f32 %v288_v21 }
  0xe1   : > { %299 = sbr.rel (%p425_p12) target bundleno = 231 (0xe7), region = 40 }
  0xe2   : > { %v481_v22 = vpop.eup %480 }
  0xe3   : > { %291 = vst [vmem:[#allocation2] sm:$0xff] %v481_v22  ;;  %vm292_vm1 = vcmp.gt.f32.partialorder %v481_v22, 0.0 }
  0xe4   : > { %v424_v24 = vsel %vm292_vm1, 1.0, %v579_v23 }
  0xe5   : > { %295 = vst [vmem:[%s185_s8] sm:$0xff] %v424_v24 }
  0xe6   : > { %300 = vst [vmem:[#allocation5] sm:$0xff] %v481_v22 }
  0xe7 PF: > { %s427_s7 = sshll.u32 %s627_s19, 3  ;;  %s314_s6 = sshll.u32 %s185_s8, 4  ;;  %s315_s6 = int_to_ptr.vmem [resolvable:$true] %s314_s6 }
  0xe8   : > { %s312_s5 = scalar_lea.hbm %s789_s3, %s427_s7  ;;  %s302_s10 = scalar_lea.sflag [#allocation4], %s183_s27 }
  0xe9   : > { %s316_s9 = sshll.u32 %s312_s5, 4  ;;  %s502_s20 = scalar_lea.hbm %s789_s3, 64  ;;  %s317_s9 = int_to_ptr.hbm [resolvable:$true] %s316_s9 }
  0xea   : > { %s496_s11 = sshra.s32 %s317_s9, 4  ;;  %s497_s11 = int_to_ptr.hbm [resolvable:$true] %s496_s11 }
  0xeb   : > { %s498_s12 = scalar_lea.hbm %s497_s11, 8  ;;  %p503_p3 = scmp.lt.s32.totalorder %s497_s11, %s789_s3 }
  0xec   : > { %p499_p13 = scmp.ne.s32.totalorder %s497_s11, %s498_s12  ;;  %p504_p4 = scmp.lt.s32.totalorder %s502_s20, %s498_s12 }
  0xee   : > { %p500_p0 = pnand %p499_p13, %p646_p5  ;;  %p505_p7 = por %p504_p4, %p503_p3 }
  0xf0   : > { %p501_p1 = pneg %p500_p0 }
  0xf2   : > { %p506_p8 = pnand %p505_p7, %p501_p1 }
  0xf4   : > { %509 = shalt.err (!%p506_p8)
}
  0xf5   : > { %432 = dma.vmem_to_hbm [thread:$0]  (%p646_p5), %s315_s6, 128, %s317_s9, %s302_s10  }
  0xf6   : > { %s580_s27 = smov [#allocation5]   ;;  %s328_s29 = sshll.u32 %s790_s4, 4  ;;  %s329_s29 = int_to_ptr.hbm [resolvable:$true] %s328_s29 }
  0xf7   : > { %s326_s28 = sshll.u32 %s580_s27, 4  ;;  %s327_s28 = int_to_ptr.vmem [resolvable:$true] %s326_s28 }
  0xf8   : > { %434 = dma.vmem_to_hbm [thread:$0]  (%p105_p2), %s327_s28, 128, %s329_s29, [#allocation6]  }
  0xf9   : > { %555 = dma.done.wait (%p105_p2), [#allocation6], 128  }
  0xfa   : > { %557 = vsyncadd (%p105_p2), [#allocation6], 4294967168 }
  0xfb PF: > { %p444_p5 = scmp.ge.s32.totalorder %s576_s18, 2  ;;  %s345_s25 = sand.u32 1, %s564_s15  }
  0xfc   : > { %s346_s30 = scalar_lea.sflag [#allocation4], %s345_s25 }
  0xfd   : > { %p439_p9 = pnand %p444_p5, %p650_p6 }
  0xff   : > { %p440_p10 = pneg %p439_p9 }
 0x101   : > { %559 = dma.done.wait (%p440_p10), %s346_s30, 128  }
 0x102   : > { %561 = vsyncadd (%p440_p10), %s346_s30, 4294967168  ;;  %p16_p11 = scmp.ge.s32.totalorder %s631_s21, 10   ;;  %s793_s15 = smov %s568_s16 }
 0x103   : > { %s794_s16 = smov %s572_s17  ;;  %s795_s17 = smov %s642_s24 }
 0x104   : > { %s796_s18 = smov %s631_s21  ;;  %18 = sbr.rel (!%p16_p11) target bundleno = 4 (0x4), region = 83 }
 0x109   :  { %352 = vsyncpa [#allocation4], 1 }
 0x10a   :  { %354 = vsyncpa [#allocation4 + $0x1], 1 }
 0x10b   :  { %355 = vsyncpa [#allocation6], 1 }

</bundles_post_ra>
